<compile_context>
chip_gen: v7x
topology: tpu7x:2x2x1
jax: 0.10.0
libtpu: 0.0.40
codegen_flags: <defaults>
</compile_context>

<pallas_src>
import math

import jax
import jax.numpy as jnp
from jax import lax
from jax.experimental import pallas as pl
from jax.experimental.pallas import tpu as pltpu

_INV_SQRT2 = 1.0 / math.sqrt(2.0)
_LN_EPS = 1e-12
_VMEM_LIMIT = 32 * 1024 * 1024


# --------------------------------------------------------------------------
# Kernels
# --------------------------------------------------------------------------
def _linear_gelu_ln_kernel(x_ref, w_ref, b_ref, g_ref, beta_ref, o_ref, acc_ref):
    """o = LayerNorm(gelu(x @ w + b)) * gamma + beta  (K accumulated over grid axis 1)."""
    k = pl.program_id(1)

    @pl.when(k == 0)
    def _():
        acc_ref[...] = jnp.zeros_like(acc_ref)

    acc_ref[...] += jnp.dot(
        x_ref[...], w_ref[...], preferred_element_type=jnp.float32
    )

    @pl.when(k == pl.num_programs(1) - 1)
    def _():
        h = acc_ref[...] + b_ref[...].astype(jnp.float32)          # (tm, H)
        # exact erf-based GeLU, fused into the matmul epilogue
        h = 0.5 * h * (1.0 + lax.erf(h * _INV_SQRT2))
        # BertLayerNorm over the hidden dim (eps = 1e-12)
        mu = jnp.mean(h, axis=-1, keepdims=True)
        var = jnp.mean(jnp.square(h - mu), axis=-1, keepdims=True)
        hn = (h - mu) * lax.rsqrt(var + _LN_EPS)
        o_ref[...] = (
            hn * g_ref[...].astype(jnp.float32) + beta_ref[...].astype(jnp.float32)
        ).astype(o_ref.dtype)


def _linear_kernel(x_ref, w_ref, b_ref, o_ref, acc_ref):
    """o = x @ w + b  (K accumulated over grid axis 1)."""
    k = pl.program_id(1)

    @pl.when(k == 0)
    def _():
        acc_ref[...] = jnp.zeros_like(acc_ref)

    acc_ref[...] += jnp.dot(
        x_ref[...], w_ref[...], preferred_element_type=jnp.float32
    )

    @pl.when(k == pl.num_programs(1) - 1)
    def _():
        o_ref[...] = (acc_ref[...] + b_ref[...].astype(jnp.float32)).astype(o_ref.dtype)


# --------------------------------------------------------------------------
# Tiling helpers
# --------------------------------------------------------------------------
def _pick_row_tile(rows):
    # Full extent for small row counts (no (8,128) issue: block == array dim);
    # otherwise 512 rows (divisible by 8), ragged tail handled by the cdiv grid.
    return rows if rows <= 512 else 512


def _pick_k_tile(k_dim):
    # Single K block when small; otherwise a clean divisor so no K-tail OOB
    # contributes garbage to the accumulator.
    if k_dim <= 2048:
        return k_dim
    for cand in (2048, 1024, 512, 256, 128):
        if k_dim % cand == 0:
            return cand
    return k_dim  # fallback: one (large) K block — still correct


def _compiler_params():
    return pltpu.CompilerParams(
        dimension_semantics=("parallel", "arbitrary"),
        vmem_limit_bytes=_VMEM_LIMIT,
    )


# --------------------------------------------------------------------------
# pallas_call wrappers
# --------------------------------------------------------------------------
def _fused_linear_gelu_ln(x2, w_t, b, gamma, beta):
    rows, in_dim = x2.shape
    hid = w_t.shape[1]
    tm = _pick_row_tile(rows)
    tk = _pick_k_tile(in_dim)
    grid = (pl.cdiv(rows, tm), in_dim // tk)

    return pl.pallas_call(
        _linear_gelu_ln_kernel,
        out_shape=jax.ShapeDtypeStruct((rows, hid), x2.dtype),
        grid_spec=pltpu.PrefetchScalarGridSpec(
            num_scalar_prefetch=0,
            grid=grid,
            in_specs=[
                pl.BlockSpec((tm, tk), lambda i, k: (i, k)),     # x tile
                pl.BlockSpec((tk, hid), lambda i, k: (k, 0)),    # w tile
                pl.BlockSpec((1, hid), lambda i, k: (0, 0)),     # bias
                pl.BlockSpec((1, hid), lambda i, k: (0, 0)),     # gamma
                pl.BlockSpec((1, hid), lambda i, k: (0, 0)),     # beta
            ],
            out_specs=pl.BlockSpec((tm, hid), lambda i, k: (i, 0)),
            scratch_shapes=[pltpu.VMEM((tm, hid), jnp.float32)],
        ),
        compiler_params=_compiler_params(),
    )(x2, w_t, b.reshape(1, hid), gamma.reshape(1, hid), beta.reshape(1, hid))


def _linear(x2, w_t, b):
    rows, k_dim = x2.shape
    n = w_t.shape[1]
    tm = _pick_row_tile(rows)
    tk = _pick_k_tile(k_dim)
    grid = (pl.cdiv(rows, tm), k_dim // tk)

    return pl.pallas_call(
        _linear_kernel,
        out_shape=jax.ShapeDtypeStruct((rows, n), x2.dtype),
        grid_spec=pltpu.PrefetchScalarGridSpec(
            num_scalar_prefetch=0,
            grid=grid,
            in_specs=[
                pl.BlockSpec((tm, tk), lambda i, k: (i, k)),
                pl.BlockSpec((tk, n), lambda i, k: (k, 0)),
                pl.BlockSpec((1, n), lambda i, k: (0, 0)),
            ],
            out_specs=pl.BlockSpec((tm, n), lambda i, k: (i, 0)),
            scratch_shapes=[pltpu.VMEM((tm, n), jnp.float32)],
        ),
        compiler_params=_compiler_params(),
    )(x2, w_t, b.reshape(1, n))


def simple_classifier_forward(hidden_states, params):
    """Pallas forward of SimpleClassifier: Linear -> GeLU -> BertLayerNorm -> Linear."""
    orig_shape = hidden_states.shape
    in_dim = orig_shape[-1]
    rows = hidden_states.size // in_dim
    x2 = hidden_states.reshape(rows, in_dim)

    h = _fused_linear_gelu_ln(
        x2, params["w1_t"], params["b1"], params["gamma"], params["beta"]
    )
    out = _linear(h, params["w2_t"], params["b2"])

    out_dim = out.shape[-1]
    return out.reshape(orig_shape[:-1] + (out_dim,))


# --------------------------------------------------------------------------
# Pure-JAX reference
# --------------------------------------------------------------------------
def simple_classifier_ref(hidden_states, params):
    xf = hidden_states.astype(jnp.float32)
    h = xf @ params["w1_t"].astype(jnp.float32) + params["b1"]
    h = 0.5 * h * (1.0 + lax.erf(h / math.sqrt(2.0)))
    mu = jnp.mean(h, axis=-1, keepdims=True)
    var = jnp.mean(jnp.square(h - mu), axis=-1, keepdims=True)
    h = (h - mu) / jnp.sqrt(var + _LN_EPS)
    h = h * params["gamma"] + params["beta"]
    out = h @ params["w2_t"].astype(jnp.float32) + params["b2"]
    return out.astype(hidden_states.dtype)


# --------------------------------------------------------------------------
# Demo / self-test
# --------------------------------------------------------------------------
if __name__ == "__main__":
    key = jax.random.PRNGKey(0)
    batch, seq, in_dim, hid_dim, out_dim = 2, 8, 32, 64, 16
    ks = jax.random.split(key, 7)

    x = jax.random.normal(ks[0], (batch, seq, in_dim), dtype=jnp.float32)
    params = {
        # weights stored pre-transposed: (in_features, out_features)
        "w1_t": jax.random.normal(ks[1], (in_dim, hid_dim), dtype=jnp.float32)
        * (1.0 / math.sqrt(in_dim)),
        "b1": 0.02 * jax.random.normal(ks[2], (hid_dim,), dtype=jnp.float32),
        "gamma": 1.0 + 0.1 * jax.random.normal(ks[3], (hid_dim,), dtype=jnp.float32),
        "beta": 0.02 * jax.random.normal(ks[4], (hid_dim,), dtype=jnp.float32),
        "w2_t": jax.random.normal(ks[5], (hid_dim, out_dim), dtype=jnp.float32)
        * (1.0 / math.sqrt(hid_dim)),
        "b2": 0.02 * jax.random.normal(ks[6], (out_dim,), dtype=jnp.float32),
    }

    y = simple_classifier_forward(x, params)
    jax.block_until_ready(y)

    y_ref = simple_classifier_ref(x, params)
    assert y.shape == (batch, seq, out_dim) and y.dtype == x.dtype
    max_err = float(jnp.max(jnp.abs(y - y_ref)))
    assert jnp.allclose(y, y_ref, atol=1e-4, rtol=1e-4), max_err

    print("KERNEL_OK")
</pallas_src>

<mosaic_0001>
module attributes {stable_mosaic.version = 11 : i64} {
  func.func @_linear_gelu_ln_kernel(%arg0: i32, %arg1: i32, %arg2: memref<16x32xf32, #tpu.memory_space<vmem>>, %arg3: memref<32x64xf32, #tpu.memory_space<vmem>>, %arg4: memref<1x64xf32, #tpu.memory_space<vmem>>, %arg5: memref<1x64xf32, #tpu.memory_space<vmem>>, %arg6: memref<1x64xf32, #tpu.memory_space<vmem>>, %arg7: memref<16x64xf32, #tpu.memory_space<vmem>>, %arg8: memref<16x64xf32, #tpu.memory_space<vmem>>) attributes {dimension_semantics = [#tpu.dimension_semantics<parallel>, #tpu.dimension_semantics<arbitrary>], iteration_bounds = array<i64: 1, 1>, scalar_prefetch = 0 : i64, scratch_operands = 1 : i64, tpu.core_type = #tpu.core_type<tc>, window_params = [{transform_indices = @transform_0, window_bounds = array<i64: 16, 32>}, {transform_indices = @transform_1, window_bounds = array<i64: 32, 64>}, {pipeline_mode = #tpu.pipeline_mode<synchronous>, transform_indices = @transform_2, window_bounds = array<i64: 1, 64>}, {pipeline_mode = #tpu.pipeline_mode<synchronous>, transform_indices = @transform_3, window_bounds = array<i64: 1, 64>}, {pipeline_mode = #tpu.pipeline_mode<synchronous>, transform_indices = @transform_4, window_bounds = array<i64: 1, 64>}, {transform_indices = @transform_5, window_bounds = array<i64: 16, 64>}]} {
    %c0_i32 = arith.constant 0 : i32
    %0 = arith.cmpi eq, %arg1, %c0_i32 : i32
    %1 = arith.extui %0 : i1 to i32
    %c0_i32_0 = arith.constant 0 : i32
    %2 = arith.cmpi ne, %1, %c0_i32_0 : i32
    scf.if %2 {
      %cst_10 = arith.constant 0.000000e+00 : f32
      %12 = vector.broadcast %cst_10 : f32 to vector<16x64xf32>
      %c0_11 = arith.constant 0 : index
      %c0_12 = arith.constant 0 : index
      %13 = vector.load %arg8[%c0_11, %c0_12] : memref<16x64xf32, #tpu.memory_space<vmem>>, vector<16x64xf32>
      tpu.vector_store %arg8[%c0_11, %c0_12], %12 {strides = array<i32>} : memref<16x64xf32, #tpu.memory_space<vmem>>, vector<16x64xf32>,
    } else {
    }
    %c0 = arith.constant 0 : index
    %c0_1 = arith.constant 0 : index
    %3 = vector.load %arg8[%c0, %c0_1] : memref<16x64xf32, #tpu.memory_space<vmem>>, vector<16x64xf32>
    %c0_2 = arith.constant 0 : index
    %c0_3 = arith.constant 0 : index
    %4 = vector.load %arg2[%c0_2, %c0_3] : memref<16x32xf32, #tpu.memory_space<vmem>>, vector<16x32xf32>
    %c0_4 = arith.constant 0 : index
    %c0_5 = arith.constant 0 : index
    %5 = vector.load %arg3[%c0_4, %c0_5] : memref<32x64xf32, #tpu.memory_space<vmem>>, vector<32x64xf32>
    %cst = arith.constant dense<0.000000e+00> : vector<16x64xf32>
    %6 = tpu.matmul %4, %5, %cst {dimension_numbers = #tpu.dot_dimension_numbers<[1], [0], [0], [1], [0, 0, 1, 1], [], []>} : vector<16x32xf32>, vector<32x64xf32>, vector<16x64xf32> -> vector<16x64xf32>
    %7 = arith.addf %3, %6 : vector<16x64xf32>
    %c0_6 = arith.constant 0 : index
    %c0_7 = arith.constant 0 : index
    %8 = vector.load %arg8[%c0_6, %c0_7] : memref<16x64xf32, #tpu.memory_space<vmem>>, vector<16x64xf32>
    tpu.vector_store %arg8[%c0_6, %c0_7], %7 {strides = array<i32>} : memref<16x64xf32, #tpu.memory_space<vmem>>, vector<16x64xf32>,
    %c0_i32_8 = arith.constant 0 : i32
    %9 = arith.cmpi eq, %arg1, %c0_i32_8 : i32
    %10 = arith.extui %9 : i1 to i32
    %c0_i32_9 = arith.constant 0 : i32
    %11 = arith.cmpi ne, %10, %c0_i32_9 : i32
    scf.if %11 {
      %c0_10 = arith.constant 0 : index
      %c0_11 = arith.constant 0 : index
      %12 = vector.load %arg8[%c0_10, %c0_11] : memref<16x64xf32, #tpu.memory_space<vmem>>, vector<16x64xf32>
      %c0_12 = arith.constant 0 : index
      %c0_13 = arith.constant 0 : index
      %13 = vector.load %arg4[%c0_12, %c0_13] : memref<1x64xf32, #tpu.memory_space<vmem>>, vector<1x64xf32>
      %14 = vector.broadcast %13 : vector<1x64xf32> to vector<16x64xf32>
      %15 = arith.addf %12, %14 : vector<16x64xf32>
      %cst_14 = arith.constant 5.000000e-01 : f32
      %16 = vector.broadcast %cst_14 : f32 to vector<16x64xf32>
      %17 = arith.mulf %16, %15 : vector<16x64xf32>
      %cst_15 = arith.constant 0.707106769 : f32
      %18 = vector.broadcast %cst_15 : f32 to vector<16x64xf32>
      %19 = arith.mulf %15, %18 : vector<16x64xf32>
      %20 = math.erf %19 : vector<16x64xf32>
      %cst_16 = arith.constant 1.000000e+00 : f32
      %21 = vector.broadcast %cst_16 : f32 to vector<16x64xf32>
      %22 = arith.addf %21, %20 : vector<16x64xf32>
      %23 = arith.mulf %17, %22 : vector<16x64xf32>
      %cst_17 = arith.constant dense<0.000000e+00> : vector<16xf32>
      %24 = vector.multi_reduction <add>, %23, %cst_17 [1] : vector<16x64xf32> to vector<16xf32>
      %25 = vector.shape_cast %24 : vector<16xf32> to vector<16x1xf32>
      %cst_18 = arith.constant 6.400000e+01 : f32
      %26 = vector.broadcast %cst_18 : f32 to vector<16x1xf32>
      %27 = arith.divf %25, %26 : vector<16x1xf32>
      %28 = vector.broadcast %27 : vector<16x1xf32> to vector<16x64xf32>
      %29 = arith.subf %23, %28 : vector<16x64xf32>
      %30 = arith.mulf %29, %29 : vector<16x64xf32>
      %cst_19 = arith.constant dense<0.000000e+00> : vector<16xf32>
      %31 = vector.multi_reduction <add>, %30, %cst_19 [1] : vector<16x64xf32> to vector<16xf32>
      %32 = vector.shape_cast %31 : vector<16xf32> to vector<16x1xf32>
      %cst_20 = arith.constant 6.400000e+01 : f32
      %33 = vector.broadcast %cst_20 : f32 to vector<16x1xf32>
      %34 = arith.divf %32, %33 : vector<16x1xf32>
      %35 = vector.broadcast %27 : vector<16x1xf32> to vector<16x64xf32>
      %36 = arith.subf %23, %35 : vector<16x64xf32>
      %cst_21 = arith.constant 9.99999996E-13 : f32
      %37 = vector.broadcast %cst_21 : f32 to vector<16x1xf32>
      %38 = arith.addf %34, %37 : vector<16x1xf32>
      %39 = math.rsqrt %38 : vector<16x1xf32>
      %40 = vector.broadcast %39 : vector<16x1xf32> to vector<16x64xf32>
      %41 = arith.mulf %36, %40 : vector<16x64xf32>
      %c0_22 = arith.constant 0 : index
      %c0_23 = arith.constant 0 : index
      %42 = vector.load %arg5[%c0_22, %c0_23] : memref<1x64xf32, #tpu.memory_space<vmem>>, vector<1x64xf32>
      %43 = vector.broadcast %42 : vector<1x64xf32> to vector<16x64xf32>
      %44 = arith.mulf %41, %43 : vector<16x64xf32>
      %c0_24 = arith.constant 0 : index
      %c0_25 = arith.constant 0 : index
      %45 = vector.load %arg6[%c0_24, %c0_25] : memref<1x64xf32, #tpu.memory_space<vmem>>, vector<1x64xf32>
      %46 = vector.broadcast %45 : vector<1x64xf32> to vector<16x64xf32>
      %47 = arith.addf %44, %46 : vector<16x64xf32>
      %c0_26 = arith.constant 0 : index
      %c0_27 = arith.constant 0 : index
      %48 = vector.load %arg7[%c0_26, %c0_27] : memref<16x64xf32, #tpu.memory_space<vmem>>, vector<16x64xf32>
      tpu.vector_store %arg7[%c0_26, %c0_27], %47 {strides = array<i32>} : memref<16x64xf32, #tpu.memory_space<vmem>>, vector<16x64xf32>,
    } else {
    }
    return
  }
  func.func @transform_0(%arg0: i32, %arg1: i32) -> (i32, i32) {
    %c0_i32 = arith.constant 0 : i32
    return %arg0, %arg1 : i32, i32
  }
  func.func @transform_1(%arg0: i32, %arg1: i32) -> (i32, i32) {
    %c0_i32 = arith.constant 0 : i32
    %c0_i32_0 = arith.constant 0 : i32
    return %arg1, %c0_i32 : i32, i32
  }
  func.func @transform_2(%arg0: i32, %arg1: i32) -> (i32, i32) {
    %c0_i32 = arith.constant 0 : i32
    %c0_i32_0 = arith.constant 0 : i32
    %c0_i32_1 = arith.constant 0 : i32
    return %c0_i32, %c0_i32_0 : i32, i32
  }
  func.func @transform_3(%arg0: i32, %arg1: i32) -> (i32, i32) {
    %c0_i32 = arith.constant 0 : i32
    %c0_i32_0 = arith.constant 0 : i32
    %c0_i32_1 = arith.constant 0 : i32
    return %c0_i32, %c0_i32_0 : i32, i32
  }
  func.func @transform_4(%arg0: i32, %arg1: i32) -> (i32, i32) {
    %c0_i32 = arith.constant 0 : i32
    %c0_i32_0 = arith.constant 0 : i32
    %c0_i32_1 = arith.constant 0 : i32
    return %c0_i32, %c0_i32_0 : i32, i32
  }
  func.func @transform_5(%arg0: i32, %arg1: i32) -> (i32, i32) {
    %c0_i32 = arith.constant 0 : i32
    %c0_i32_0 = arith.constant 0 : i32
    return %arg0, %c0_i32 : i32, i32
  }
}

</mosaic_0001>

<bundles_post_ra>
// kernel: tpu_custom_call.1
= control target key start
LH: loop header
LB: loop body
LE: loop exit
PB: predicated region body
PF: predicated region fallthrough
CT: control target
= control target key end

     0   :  { %10 = vsyncpa [#allocation4], 0  ;;  %s456_s0 = inlined_call_operand.hbm [shape: f32[16,32], index: 0, kind: input, shape index: {}]   ;;  %s457_s1 = inlined_call_operand.hbm [shape: f32[32,64], index: 1, kind: input, shape index: {}]   ;;  %s458_s2 = inlined_call_operand.vmem [shape: f32[1,64], index: 2, kind: input, shape index: {}]   ;;  %s459_s3 = inlined_call_operand.vmem [shape: f32[1,64], index: 3, kind: input, shape index: {}]   ;;  %s460_s4 = inlined_call_operand.vmem [shape: f32[1,64], index: 4, kind: input, shape index: {}]   ;;  %s461_s5 = inlined_call_operand.hbm [shape: f32[16,64], index: 5, kind: output, shape index: {}]  }
   0x1   :  { %11 = vsyncpa [#allocation7], 0 }
   0x2   :  { %12 = vsyncpa [#allocation5], 0  ;;  %s356_s18 = smov [#allocation3]   ;;  %s284_s22 = scalar_lea.hbm %s456_s0, 256 }
   0x3   :  { %s18_s19 = sshll.u32 %s356_s18, 4  ;;  %p285_p0 = scmp.ne.s32.totalorder %s456_s0, %s284_s22  ;;  %s19_s19 = int_to_ptr.vmem [resolvable:$true] %s18_s19 }
   0x4   :  { %p288_p1 = scmp.lt.u32.totalorder %s284_s22, %s456_s0 }
   0x6   :  { %p290_p2 = pnand %p288_p1, %p285_p0 }
   0x8   :  { %293 = shalt.err (!%p290_p2)
}
   0x9   :  { %s294_s27 = scalar_lea.vmem %s19_s19, 256  ;;  %p299_p4 = scmp.lt.s32.totalorder %s19_s19, %s19_s19 }
   0xa   :  { %p295_p3 = scmp.ne.s32.totalorder %s19_s19, %s294_s27  ;;  %p300_p5 = scmp.lt.s32.totalorder %s294_s27, %s294_s27 }
   0xc   :  { %p301_p6 = por %p300_p5, %p299_p4 }
   0xe   :  { %p302_p7 = pnand %p301_p6, %p295_p3 }
  0x10   :  { %305 = shalt.err (!%p302_p7)
}
  0x11   :  { %s357_s28 = smov 128   ;;  %s358_s29 = smov 8  }
  0x12   :  { %24 = dma.hbm_to_vmem [thread:$0]  %s456_s0, 256, %s19_s19, [#allocation4], %s357_s28, %s357_s28, %s358_s29  }
  0x13   :  { %s359_s7 = smov [#allocation6]   ;;  %s306_s11 = scalar_lea.hbm %s457_s1, 512 }
  0x14   :  { %s30_s8 = sshll.u32 %s359_s7, 4  ;;  %p307_p8 = scmp.ne.s32.totalorder %s457_s1, %s306_s11  ;;  %s31_s8 = int_to_ptr.vmem [resolvable:$true] %s30_s8 }
  0x15   :  { %p310_p9 = scmp.lt.u32.totalorder %s306_s11, %s457_s1 }
  0x17   :  { %p312_p10 = pnand %p310_p9, %p307_p8 }
  0x19   :  { %315 = shalt.err (!%p312_p10)
}
  0x1a   :  { %s316_s16 = scalar_lea.vmem %s31_s8, 512  ;;  %p321_p12 = scmp.lt.s32.totalorder %s31_s8, %s31_s8 }
  0x1b   :  { %p317_p11 = scmp.ne.s32.totalorder %s31_s8, %s316_s16  ;;  %p322_p13 = scmp.lt.s32.totalorder %s316_s16, %s316_s16 }
  0x1d   :  { %p323_p0 = por %p322_p13, %p321_p12 }
  0x1f   :  { %p324_p1 = pnand %p323_p0, %p317_p11 }
  0x21   :  { %327 = shalt.err (!%p324_p1)
}
  0x22   :  { %36 = dma.hbm_to_vmem [thread:$0]  %s457_s1, 512, %s31_s8, [#allocation7], %s357_s28, %s357_s28, %s358_s29  }
  0x23   :  { %350 = dma.done.wait [#allocation4], 256  }
  0x24   :  { %351 = vsyncadd [#allocation4], 4294967040 }
  0x25   :  { %352 = dma.done.wait [#allocation7], 512  }
  0x26   :  { %353 = vsyncadd [#allocation7], 4294966784  ;;  %vm53_vm0 = vcmask 523264   ;;  %v360_v0 = vmov 0.0   ;;  %vm64_vm1 = vcmask 261120   ;;  %v60_v1 = vld [vmem:[#allocation6] sm:$0xff] }
  0x27   :  { %55 = vst.msk [vmem:[#allocation2 + $0x8] sm:$0xff] %vm53_vm0, %v360_v0  ;;  %54 = vst.msk [vmem:[#allocation2] sm:$0xff] %vm53_vm0, %v360_v0  ;;  %v61_v2 = vld [vmem:[#allocation6 + $0x8] sm:$0xff]  ;;  %v62_v3 = vld [vmem:[#allocation6 + $0x10] sm:$0xff]  ;;  %s361_s22 = smov [#allocation8]  }
  0x28   :  { %v262_v4 = vpack.c.bf16 %v61_v2, %v60_v1  ;;  %v63_v5 = vld [vmem:[#allocation6 + $0x18] sm:$0xff]  ;;  %v58_v6 = vld [vmem:[#allocation3] sm:$0xff]  ;;  %v242_v15 = vld [vmem:[%s458_s2] ss:$0 sm:$0xff]  ;;  %s227_s23 = sshll.u32 %s361_s22, 4  ;;  %s228_s23 = int_to_ptr.vmem [resolvable:$true] %s227_s23 }
  0x29   :  { %v266_v7 = vpack.c.bf16 %v63_v5, %v62_v3  ;;  %259 = vmatprep.mubr.msk.f32.mxu0 %vm64_vm1, %v58_v6  ;;  %v59_v8 = vld [vmem:[#allocation3 + $0x8] sm:$0xff]  ;;  %v243_v49 = vld [vmem:[%s459_s3] ss:$0 sm:$0xff]  ;;  %s328_s24 = scalar_lea.vmem %s228_s23, 256  ;;  %p333_p3 = scmp.lt.s32.totalorder %s228_s23, %s228_s23 }
  0x2a   :  { %263 = vmatprep.subr.bf16.mxu0 %v262_v4  ;;  %v244_v51 = vld [vmem:[%s460_s4] ss:$0 sm:$0xff]  ;;  %p329_p2 = scmp.ne.s32.totalorder %s228_s23, %s328_s24  ;;  %p334_p4 = scmp.lt.s32.totalorder %s328_s24, %s328_s24 }
  0x2b   :  { %265 = vmatpush3.bf16.msra.mxu0 %v262_v4 }
  0x2c   :  { %267 = vmatprep.subr.bf16.mxu0 %v266_v7  ;;  %p335_p5 = por %p334_p4, %p333_p3 }
  0x2e   :  { %v57_v9 = vld [vmem:[#allocation2 + $0x8] sm:$0xff]  ;;  %v56_v10 = vld [vmem:[#allocation2] sm:$0xff]  ;;  %p336_p6 = pnand %p335_p5, %p329_p2 }
  0x2f   :  { %269 = vmatpush3.bf16.msra.mxu0 %v266_v7 }
  0x32   :  { %260 = vmatmul.mubr.msk.f32.vlgmr.msra.gmra.mrb[0].mxu0 %vm64_vm1, %v59_v8 }
 0x105   :  { %v261_v11 = vpop.f32.mrb[0].mxu0 }
 0x106   :  { %v147_v12 = vadd.f32 %v261_v11, %v57_v9  ;;  %v137_v13 = vpop.f32.mrb[1].mxu0 }
 0x107   :  { %v146_v14 = vadd.f32 %v137_v13, %v56_v10 }
 0x108   :  { %150 = vst.msk [vmem:[#allocation2 + $0x8] sm:$0xff] %vm53_vm0, %v147_v12 }
 0x109   :  { %149 = vst.msk [vmem:[#allocation2] sm:$0xff] %vm53_vm0, %v146_v14 }
 0x10f   :  { %v155_v16 = vld [vmem:[#allocation2 + $0x8] sm:$0xff] }
 0x110   :  { %v154_v17 = vld [vmem:[#allocation2] sm:$0xff]  ;;  %v164_v18 = vadd.f32 %v242_v15, %v155_v16 }
 0x111   :  { %v163_v19 = vadd.f32 %v242_v15, %v154_v17 }
 0x112   :  { %v168_v20 = vmul.f32 0.70710677, %v164_v18  ;;  %v166_v28 = vmul.f32 0.5, %v164_v18 }
 0x113   :  { %v167_v21 = vmul.f32 0.70710677, %v163_v19  ;;  %v165_v24 = vmul.f32 0.5, %v163_v19 }
 0x114   :  { %276 = verf.f32 %v168_v20 }
 0x115   :  { %278 = verf.f32 %v167_v21 }
 0x11e   :  { %v277_v22 = vpop.eup %276 }
 0x11f   :  { %v279_v23 = vpop.eup %278  ;;  %v172_v26 = vadd.f32 1.0, %v277_v22 }
 0x120   :  { %v171_v25 = vadd.f32 1.0, %v279_v23 }
 0x121   :  { %v174_v30 = vmul.f32 %v172_v26, %v166_v28 }
 0x122   :  { %v173_v27 = vmul.f32 %v171_v25, %v165_v24 }
 0x123   :  { %v178_v31 = vsel %vm53_vm0, %v174_v30, 0.0 }
 0x124   :  { %v175_v29 = vsel %vm53_vm0, %v173_v27, 0.0 }
 0x125   :  { %176 = vadd.xlane.f32.xlu0 %v175_v29 }
 0x129   :  { %179 = vadd.xlane.f32.xlu0 %v178_v31 }
 0x1b2   :  { %v177_v32 = vpop.xlane.xlu0 %176 }
 0x1b3   :  { %v182_v33 = vmul.f32 0.015625, %v177_v32 }
 0x1b5   :  { %v184_v34 = vsub.f32 %v173_v27, %v182_v33 }
 0x1b6   :  { %v180_v35 = vpop.xlane.xlu0 %179 }
 0x1b7   :  { %v183_v36 = vmul.f32 0.015625, %v180_v35  ;;  %v186_v37 = vmul.f32 %v184_v34, %v184_v34 }
 0x1b9   :  { %v185_v38 = vsub.f32 %v174_v30, %v183_v36  ;;  %v188_v39 = vsel %vm53_vm0, %v186_v37, 0.0 }
 0x1ba   :  { %189 = vadd.xlane.f32.xlu1 %v188_v39 }
 0x1bb   :  { %v187_v40 = vmul.f32 %v185_v38, %v185_v38 }
 0x1bd   :  { %v191_v41 = vsel %vm53_vm0, %v187_v40, 0.0 }
 0x1be   :  { %192 = vadd.xlane.f32.xlu1 %v191_v41 }
 0x247   :  { %v190_v42 = vpop.xlane.xlu1 %189 }
 0x248   :  { %v194_v43 = vmul.f32 0.015625, %v190_v42 }
 0x24a   :  { %v196_v44 = vadd.f32 1e-12, %v194_v43 }
 0x24b   :  { %v193_v45 = vpop.xlane.xlu1 %192 }
 0x24c   :  { %280 = vrsqrt.f32 %v196_v44  ;;  %v195_v46 = vmul.f32 0.015625, %v193_v45 }
 0x24e   :  { %v197_v47 = vadd.f32 1e-12, %v195_v46 }
 0x250   :  { %282 = vrsqrt.f32 %v197_v47 }
 0x256   :  { %v281_v48 = vpop.eup %280 }
 0x257   :  { %v200_v50 = vmul.f32 %v281_v48, %v184_v34 }
 0x259   :  { %v209_v52 = vmul.f32 %v243_v49, %v200_v50 }
 0x25a   :  { %v283_v53 = vpop.eup %282 }
 0x25b   :  { %v201_v54 = vmul.f32 %v283_v53, %v185_v38  ;;  %v218_v55 = vadd.f32 %v244_v51, %v209_v52 }
 0x25d   :  { %v210_v56 = vmul.f32 %v243_v49, %v201_v54  ;;  %220 = vst.msk [vmem:[#allocation8] sm:$0xff] %vm53_vm0, %v218_v55 }
 0x25f   :  { %v219_v57 = vadd.f32 %v244_v51, %v210_v56 }
 0x261   :  { %221 = vst.msk [vmem:[#allocation8 + $0x8] sm:$0xff] %vm53_vm0, %v219_v57 }
 0x262   :  { %339 = shalt.err (!%p336_p6)
}
 0x263   :  { %s340_s25 = scalar_lea.hbm %s461_s5, 256 }
 0x264   :  { %p341_p7 = scmp.ne.s32.totalorder %s461_s5, %s340_s25  ;;  %p344_p8 = scmp.lt.u32.totalorder %s340_s25, %s461_s5 }
 0x266   :  { %p346_p9 = pnand %p344_p8, %p341_p7 }
 0x268   :  { %349 = shalt.err (!%p346_p9)
}
 0x269   :  { %233 = dma.vmem_to_hbm [thread:$0]  %s228_s23, 256, %s461_s5, [#allocation5], %s357_s28, %s357_s28, %s358_s29  }
 0x26a   :  { %354 = dma.done.wait [#allocation5], 256  }
 0x26b   :  { %355 = vsyncadd [#allocation5], 4294967040 }
 0x26c   :  { %237 = vsyncpa [#allocation4], 1 }
 0x26d   :  { %238 = vsyncpa [#allocation7], 1 }
 0x26e   :  { %239 = vsyncpa [#allocation5], 1 }

</bundles_post_ra>
